<compile_context>
chip_gen: v5e
topology: v5e:2x2
jax: 0.10.0
libtpu: 0.0.40
codegen_flags: <defaults>
</compile_context>

<pallas_src>
import jax
import jax.numpy as jnp
from jax import lax
from jax.experimental import pallas as pl
from jax.experimental.pallas import tpu as pltpu


def _mse_cosine_kernel(x_ref, label_ref, score_ref, sqerr_ref):
    # x_ref: (TB, S, D) input dtype ; label_ref/score_ref/sqerr_ref: (TB, 1) f32
    _, s, _ = x_ref.shape
    x = x_ref[...].astype(jnp.float32)

    e1 = x[:, 0, :]                                                   # (TB, D)
    # mean over segments 1..S-1  ==  (sum over all S  -  e1) * 1/(S-1)
    # (avoids a sublane-offset slice; multiply instead of divide)
    e2 = (jnp.sum(x, axis=1) - e1) * jnp.float32(1.0 / (s - 1))       # (TB, D)

    # Per-row reductions stay on sublanes, so results are already laid out for
    # the (TB, 1) outputs (no sublane->lane transpose).
    dot = jnp.sum(e1 * e2, axis=-1, keepdims=True)                    # (TB, 1)
    n1sq = jnp.sum(e1 * e1, axis=-1, keepdims=True)                   # (TB, 1)
    n2sq = jnp.sum(e2 * e2, axis=-1, keepdims=True)                   # (TB, 1)

    # max(||e||, eps) == sqrt(max(||e||^2, eps^2)); rsqrt runs on the EUP.
    eps_sq = jnp.float32(1e-8 * 1e-8)
    inv_norms = lax.rsqrt(jnp.maximum(n1sq, eps_sq)) * lax.rsqrt(jnp.maximum(n2sq, eps_sq))
    score = dot * inv_norms                                           # (TB, 1)

    diff = score - label_ref[...]
    score_ref[...] = score
    sqerr_ref[...] = diff * diff


def mse_cosine_loss(x, label, *, block_b=None, tile_budget_bytes=8 * 1024 * 1024):
    """x: (B, S, D) float32/bfloat16, label: (B,) -> (loss scalar f32, score (B,) f32)."""
    B, S, D = x.shape
    itemsize = jnp.dtype(x.dtype).itemsize
    row_bytes = S * D * itemsize

    if block_b is None:
        # 2 pipeline buffers * block_b * row_bytes  <=  tile_budget_bytes
        tb = tile_budget_bytes // (2 * row_bytes)
        tb = max(8, min(int(tb), 1024))
        tb = (tb // 8) * 8
        block_b = B if tb >= B else tb
    else:
        block_b = min(int(block_b), B)
    if block_b < B:
        # (TB, 1) output blocks need TB % 8 == 0 unless TB == B.
        block_b = max(8, (block_b // 8) * 8)
        if block_b >= B:
            block_b = B

    nb = pl.cdiv(B, block_b)
    label2d = label.reshape(B, 1).astype(jnp.float32)

    tile_bytes = block_b * row_bytes
    # Explicit scoped-VMEM limit: well under v7x's 64 MiB physical VMEM.
    vmem_limit = int(min(60 * 1024 * 1024, max(32 * 1024 * 1024, 6 * tile_bytes)))

    score, sqerr = pl.pallas_call(
        _mse_cosine_kernel,
        out_shape=(
            jax.ShapeDtypeStruct((B, 1), jnp.float32),
            jax.ShapeDtypeStruct((B, 1), jnp.float32),
        ),
        grid_spec=pltpu.PrefetchScalarGridSpec(
            num_scalar_prefetch=0,
            grid=(nb,),
            in_specs=[
                pl.BlockSpec((block_b, S, D), lambda i: (i, 0, 0)),
                pl.BlockSpec((block_b, 1), lambda i: (i, 0)),
            ],
            out_specs=(
                pl.BlockSpec((block_b, 1), lambda i: (i, 0)),
                pl.BlockSpec((block_b, 1), lambda i: (i, 0)),
            ),
        ),
        compiler_params=pltpu.CompilerParams(
            dimension_semantics=("parallel",),
            vmem_limit_bytes=vmem_limit,
        ),
    )(x, label2d)

    # MSELoss (mean reduction) over B rows; trivial final reduce done in XLA so
    # the batch grid axis can stay "parallel" across TensorCores.
    loss = jnp.mean(sqerr[:, 0])
    return loss, score[:, 0]


if __name__ == "__main__":
    key = jax.random.PRNGKey(0)
    kx, kl = jax.random.split(key)

    B, S, D = 32, 8, 32  # batch, segments (1 anchor + 7 averaged), embedding dim
    x = jax.random.normal(kx, (B, S, D), dtype=jnp.float32)
    label = jax.random.uniform(kl, (B,), dtype=jnp.float32, minval=-1.0, maxval=1.0)

    # block_b=8 forces a 4-step grid so the pipelined path is exercised.
    loss, score = mse_cosine_loss(x, label, block_b=8)
    jax.block_until_ready((loss, score))

    # Pure-JAX reference (same semantics as the PyTorch module).
    e1 = x[:, 0, :]
    e2 = jnp.mean(x[:, 1:, :], axis=1)
    ref_score = jnp.sum(e1 * e2, -1) / (
        jnp.maximum(jnp.linalg.norm(e1, axis=-1), 1e-8)
        * jnp.maximum(jnp.linalg.norm(e2, axis=-1), 1e-8)
    )
    ref_loss = jnp.mean((ref_score - label) ** 2)
    assert jnp.allclose(score, ref_score, atol=1e-5), (score, ref_score)
    assert jnp.allclose(loss, ref_loss, atol=1e-5), (loss, ref_loss)

    # Also exercise the single-block (block_b = B) fast path.
    loss_full, score_full = mse_cosine_loss(x, label)
    jax.block_until_ready((loss_full, score_full))
    assert jnp.allclose(score_full, ref_score, atol=1e-5)
    assert jnp.allclose(loss_full, ref_loss, atol=1e-5)

    print("KERNEL_OK")
</pallas_src>

<mosaic_0001>
module attributes {stable_mosaic.version = 11 : i64} {
  func.func @_mse_cosine_kernel(%arg0: i32, %arg1: memref<8x8x32xf32, #tpu.memory_space<vmem>>, %arg2: memref<8x1xf32, #tpu.memory_space<vmem>>, %arg3: memref<8x1xf32, #tpu.memory_space<vmem>>, %arg4: memref<8x1xf32, #tpu.memory_space<vmem>>) attributes {dimension_semantics = [#tpu.dimension_semantics<parallel>], iteration_bounds = array<i64: 4>, scalar_prefetch = 0 : i64, scratch_operands = 0 : i64, tpu.core_type = #tpu.core_type<tc>, window_params = [{transform_indices = @transform_0, window_bounds = array<i64: 8, 8, 32>}, {transform_indices = @transform_1, window_bounds = array<i64: 8, 1>}, {transform_indices = @transform_2, window_bounds = array<i64: 8, 1>}, {transform_indices = @transform_3, window_bounds = array<i64: 8, 1>}]} {
    %c0 = arith.constant 0 : index
    %c0_0 = arith.constant 0 : index
    %c0_1 = arith.constant 0 : index
    %0 = vector.load %arg1[%c0, %c0_0, %c0_1] : memref<8x8x32xf32, #tpu.memory_space<vmem>>, vector<8x8x32xf32>
    %1 = vector.extract_strided_slice %0 {offsets = [0, 0, 0], sizes = [8, 1, 32], strides = [1, 1, 1]} : vector<8x8x32xf32> to vector<8x1x32xf32>
    %2 = vector.shape_cast %1 : vector<8x1x32xf32> to vector<8x32xf32>
    %cst = arith.constant dense<0.000000e+00> : vector<8x32xf32>
    %3 = vector.multi_reduction <add>, %0, %cst [1] : vector<8x8x32xf32> to vector<8x32xf32>
    %4 = arith.subf %3, %2 : vector<8x32xf32>
    %cst_2 = arith.constant 0.142857149 : f32
    %5 = vector.broadcast %cst_2 : f32 to vector<8x32xf32>
    %6 = arith.mulf %4, %5 : vector<8x32xf32>
    %7 = arith.mulf %2, %6 : vector<8x32xf32>
    %cst_3 = arith.constant dense<0.000000e+00> : vector<8xf32>
    %8 = vector.multi_reduction <add>, %7, %cst_3 [1] : vector<8x32xf32> to vector<8xf32>
    %9 = vector.shape_cast %8 : vector<8xf32> to vector<8x1xf32>
    %10 = arith.mulf %2, %2 : vector<8x32xf32>
    %cst_4 = arith.constant dense<0.000000e+00> : vector<8xf32>
    %11 = vector.multi_reduction <add>, %10, %cst_4 [1] : vector<8x32xf32> to vector<8xf32>
    %12 = vector.shape_cast %11 : vector<8xf32> to vector<8x1xf32>
    %13 = arith.mulf %6, %6 : vector<8x32xf32>
    %cst_5 = arith.constant dense<0.000000e+00> : vector<8xf32>
    %14 = vector.multi_reduction <add>, %13, %cst_5 [1] : vector<8x32xf32> to vector<8xf32>
    %15 = vector.shape_cast %14 : vector<8xf32> to vector<8x1xf32>
    %cst_6 = arith.constant 1.000000e-16 : f32
    %16 = vector.broadcast %cst_6 : f32 to vector<8x1xf32>
    %17 = arith.maximumf %12, %16 : vector<8x1xf32>
    %18 = math.rsqrt %17 : vector<8x1xf32>
    %cst_7 = arith.constant 1.000000e-16 : f32
    %19 = vector.broadcast %cst_7 : f32 to vector<8x1xf32>
    %20 = arith.maximumf %15, %19 : vector<8x1xf32>
    %21 = math.rsqrt %20 : vector<8x1xf32>
    %22 = arith.mulf %18, %21 : vector<8x1xf32>
    %23 = arith.mulf %9, %22 : vector<8x1xf32>
    %c0_8 = arith.constant 0 : index
    %c0_9 = arith.constant 0 : index
    %24 = vector.load %arg2[%c0_8, %c0_9] : memref<8x1xf32, #tpu.memory_space<vmem>>, vector<8x1xf32>
    %25 = arith.subf %23, %24 : vector<8x1xf32>
    %c0_10 = arith.constant 0 : index
    %c0_11 = arith.constant 0 : index
    %26 = vector.load %arg3[%c0_10, %c0_11] : memref<8x1xf32, #tpu.memory_space<vmem>>, vector<8x1xf32>
    tpu.vector_store %arg3[%c0_10, %c0_11], %23 {strides = array<i32>} : memref<8x1xf32, #tpu.memory_space<vmem>>, vector<8x1xf32>,
    %27 = arith.mulf %25, %25 : vector<8x1xf32>
    %c0_12 = arith.constant 0 : index
    %c0_13 = arith.constant 0 : index
    %28 = vector.load %arg4[%c0_12, %c0_13] : memref<8x1xf32, #tpu.memory_space<vmem>>, vector<8x1xf32>
    tpu.vector_store %arg4[%c0_12, %c0_13], %27 {strides = array<i32>} : memref<8x1xf32, #tpu.memory_space<vmem>>, vector<8x1xf32>,
    return
  }
  func.func @transform_0(%arg0: i32) -> (i32, i32, i32) {
    %c0_i32 = arith.constant 0 : i32
    %c0_i32_0 = arith.constant 0 : i32
    %c0_i32_1 = arith.constant 0 : i32
    return %arg0, %c0_i32, %c0_i32_0 : i32, i32, i32
  }
  func.func @transform_1(%arg0: i32) -> (i32, i32) {
    %c0_i32 = arith.constant 0 : i32
    %c0_i32_0 = arith.constant 0 : i32
    return %arg0, %c0_i32 : i32, i32
  }
  func.func @transform_2(%arg0: i32) -> (i32, i32) {
    %c0_i32 = arith.constant 0 : i32
    %c0_i32_0 = arith.constant 0 : i32
    return %arg0, %c0_i32 : i32, i32
  }
  func.func @transform_3(%arg0: i32) -> (i32, i32) {
    %c0_i32 = arith.constant 0 : i32
    %c0_i32_0 = arith.constant 0 : i32
    return %arg0, %c0_i32 : i32, i32
  }
}

</mosaic_0001>

<bundles_post_ra>
// kernel: tpu_custom_call.1
= control target key start
LH: loop header
LB: loop body
LE: loop exit
PB: predicated region body
PF: predicated region fallthrough
CT: control target
= control target key end

     0   :  { %9 = vsyncpa [#allocation3], 0  ;;  %s881_s0 = inlined_call_operand.hbm [shape: f32[32,8,32], index: 0, kind: input, shape index: {}]   ;;  %s882_s1 = inlined_call_operand.vmem [shape: f32[32,1], index: 1, kind: input, shape index: {}]   ;;  %s883_s2 = inlined_call_operand.vmem [shape: f32[32,1], index: 2, kind: output, shape index: {0}]   ;;  %s884_s3 = inlined_call_operand.vmem [shape: f32[32,1], index: 3, kind: output, shape index: {1}]  }
   0x1   :  { %11 = vsyncpa [#allocation3 + $0x1], 0  ;;  %s695_s12 = smov 0   ;;  %s697_s13 = smov 0  }
   0x2   :  { %s699_s14 = smov 0   ;;  %s701_s15 = smov 0  }
   0x3 LB: > { %s714_s16 = sadd.s32 4294967295, %s671_s15   ;;  %s717_s17 = sadd.s32 1, %s671_s15   ;;  %s671_s15 = sphi %s701_s15, %s891_s15   ;;  %s667_s14 = sphi %s699_s14, %s890_s14   ;;  %s663_s13 = sphi %s697_s13, %s889_s13   ;;  %s659_s12 = sphi %s695_s12, %s888_s12  }
   0x4   : > { %s21_s18 = ssub.s32 %s671_s15, %s717_s17  ;;  %s24_s19 = sadd.s32 1, %s667_s14 }
   0x5   : > { %p22_p0 = scmp.eq.s32.totalorder %s21_s18, 0  ;;  %p31_p1 = scmp.ne.s32.totalorder %s667_s14, %s663_s13 }
   0x6   : > { %p32_p2 = scmp.eq.s32.totalorder %s671_s15, 0  ;;  %p37_p3 = scmp.ne.s32.totalorder %s663_s13, %s659_s12 }
   0x7   : > { %s727_s20 = scalar_select %p22_p0, %s667_s14, %s24_s19  }
   0x8   : > { %p729_p4 = por %p32_p2, %p31_p1  ;;  %p38_p5 = scmp.eq.s32.totalorder %s714_s16, 0 }
   0x9   : > { %p568_p6 = scmp.lt.s32.totalorder %s671_s15, 4  ;;  %s139_s23 = sand.u32 1, %s667_s14  }
   0xa   : > { %p735_p7 = por %p38_p5, %p37_p3  ;;  %s551_s24 = sshll.u32 %s139_s23, 6 }
   0xb   : > { %s561_s25 = sshll.u32 %s671_s15, 6  ;;  %s143_s29 = scalar_lea.vmem [#allocation2], %s551_s24 }
   0xc   : > { %s148_s28 = scalar_lea.hbm %s881_s0, %s561_s25  ;;  %s151_s30 = sshll.u32 %s143_s29, 4  ;;  %s152_s30 = int_to_ptr.vmem [resolvable:$true] %s151_s30 }
   0xd   : > { %s149_s4 = sshll.u32 %s148_s28, 4  ;;  %p746_p8 = pnand %p568_p6, %p729_p4  ;;  %s150_s4 = int_to_ptr.hbm [resolvable:$true] %s149_s4 }
   0xe   : > { %p554_p9 = scmp.ge.s32.totalorder %s671_s15, 1  ;;  %s140_s6 = scalar_lea.sflag [#allocation3], %s139_s23 }
   0xf   : > { %s607_s7 = sshra.s32 %s150_s4, 4  ;;  %p611_p11 = pneg %p746_p8  ;;  %s608_s7 = int_to_ptr.hbm [resolvable:$true] %s607_s7 }
  0x10   : > { %s609_s8 = scalar_lea.hbm %s608_s7, 64  ;;  %s614_s11 = scalar_lea.hbm %s881_s0, 256 }
  0x11   : > { %p610_p10 = scmp.ne.s32.totalorder %s608_s7, %s609_s8  ;;  %p615_p0 = scmp.lt.s32.totalorder %s608_s7, %s881_s0 }
  0x12   : > { %p616_p1 = scmp.lt.s32.totalorder %s614_s11, %s609_s8 }
  0x13   : > { %p612_p12 = pnand %p611_p11, %p610_p10 }
  0x14   : > { %p617_p2 = por %p616_p1, %p615_p0 }
  0x15   : > { %p613_p13 = pneg %p612_p12 }
  0x17   : > { %p618_p3 = pnand %p617_p2, %p613_p13 }
  0x19   : > { %621 = shalt.err (!%p618_p3)
}
  0x1a   : > { %s673_s19 = smov 128   ;;  %s674_s21 = smov 8  }
  0x1b   : > { %567 = dma.hbm_to_vmem [thread:$0]  (!%p746_p8), %s150_s4, 1024, %s152_s30, %s140_s6, %s673_s19, %s673_s19, %s674_s21  }
  0x1c   : > { %p166_p4 = scmp.lt.s32.totalorder %s671_s15, 5 }
  0x1e   : > { %p167_p5 = pnand %p554_p9, %p166_p4 }
  0x1f   : > { %s172_s23 = sand.u32 (!%p167_p5), 1, %s663_s13  }
  0x20   : > { %170 = sbr.rel (%p167_p5) target bundleno = 221 (0xdd), region = 28  ;;  %s555_s24 = sshll.u32 (!%p167_p5), %s172_s23, 6 }
  0x21   : > { %s173_s25 = scalar_lea.sflag (!%p167_p5), [#allocation3], %s172_s23  ;;  %s176_s26 = scalar_lea.vmem (!%p167_p5), [#allocation2], %s555_s24 }
  0x25   : > { %654 = dma.done.wait (%p735_p7), %s173_s25, 1024  }
  0x26   : > { %656 = vsyncadd (%p735_p7), %s173_s25, 4294966272  ;;  %vm228_vm0 = vcmask 261120   ;;  %v769_v0 = vld [vmem:[%s176_s26] sm:$0xff]  ;;  %v771_v1 = vld [vmem:[%s176_s26 + $0x8] sm:$0xff]  ;;  %vm318_vm1 = vcmask 1041409   ;;  %vm321_vm2 = vcmask 1042434  }
  0x27   : > { %v773_v2 = vld [vmem:[%s176_s26 + $0x10] sm:$0xff]  ;;  %v775_v3 = vld [vmem:[%s176_s26 + $0x18] sm:$0xff]  ;;  %v777_v4 = vld [vmem:[%s176_s26 + $0x20] sm:$0xff]  ;;  %v236_v6 = vsel %vm228_vm0, %v771_v1, 0.0  ;;  %vm324_vm3 = vcmask 1043459   ;;  %v342_v8 = vmul.f32 %v769_v0, %v769_v0  ;;  %v343_v9 = vmul.f32 %v771_v1, %v771_v1  ;;  %p208_p6 = scmp.lt.s32.totalorder %s714_s16, 3 }
  0x28   : > { %v779_v5 = vld [vmem:[%s176_s26 + $0x28] sm:$0xff]  ;;  %v243_v7 = vsel %vm228_vm0, %v773_v2, 0.0  ;;  %v789_v10 = vld [vmem:[%s176_s26 + $0x30] sm:$0xff]  ;;  %v791_v11 = vld [vmem:[%s176_s26 + $0x38] sm:$0xff]  ;;  %v237_v12 = vrot.slane %v236_v6, 4  ;;  %v250_v14 = vsel %vm228_vm0, %v775_v3, 0.0  ;;  %v344_v27 = vmul.f32 %v773_v2, %v773_v2 }
  0x29   : > { %v244_v13 = vrot.slane %v243_v7, 4  ;;  %v257_v15 = vsel %vm228_vm0, %v777_v4, 0.0  ;;  %vm327_vm4 = vcmask 1044484   ;;  %v251_v16 = vrot.slane %v250_v14, 4  ;;  %s893_s16 = smov (!%p208_p6, %s714_s16), 3 }
  0x2a   : > { %v258_v17 = vrot.slane %v257_v15, 4  ;;  %v264_v18 = vsel %vm228_vm0, %v779_v5, 0.0  ;;  %v271_v19 = vsel %vm228_vm0, %v789_v10, 0.0  ;;  %vm330_vm5 = vcmask 1045509   ;;  %s556_s15 = sshll.u32 %s893_s16, 3 }
  0x2b   : > { %v238_v20 = vadd.f32 %v237_v12, %v236_v6  ;;  %v245_v21 = vadd.f32 %v244_v13, %v243_v7  ;;  %v265_v22 = vrot.slane %v264_v18, 4  ;;  %v272_v23 = vrot.slane %v271_v19, 4  ;;  %s211_s28 = scalar_lea.vmem %s882_s1, %s556_s15  ;;  %s215_s4 = scalar_lea.vmem %s883_s2, %s556_s15 }
  0x2c   : > { %vm333_vm6 = vcmask 1046534   ;;  %v252_v24 = vadd.f32 %v251_v16, %v250_v14  ;;  %v259_v25 = vadd.f32 %v258_v17, %v257_v15  ;;  %v278_v26 = vsel %vm228_vm0, %v791_v11, 0.0  ;;  %s219_s6 = scalar_lea.vmem %s884_s3, %s556_s15 }
  0x2d   : > { %vm336_vm7 = vcmask 1047559   ;;  %v266_v28 = vadd.f32 %v265_v22, %v264_v18  ;;  %v273_v29 = vadd.f32 %v272_v23, %v271_v19  ;;  %v279_v30 = vrot.slane %v278_v26, 4 }
  0x2e   : > { %v345_v31 = vmul.f32 %v775_v3, %v775_v3  ;;  %v346_v32 = vmul.f32 %v777_v4, %v777_v4  ;;  %v347_v33 = vmul.f32 %v779_v5, %v779_v5  ;;  %v348_v34 = vmul.f32 %v789_v10, %v789_v10 }
  0x2f   : > { %v349_v35 = vmul.f32 %v791_v11, %v791_v11  ;;  %v280_v36 = vadd.f32 %v279_v30, %v278_v26  ;;  %v358_v37 = vrot.slane %v343_v9, 7  ;;  %v360_v38 = vrot.slane %v344_v27, 6 }
  0x30   : > { %v362_v39 = vrot.slane %v345_v31, 5  ;;  %v364_v40 = vrot.slane %v346_v32, 4  ;;  %v366_v41 = vrot.slane %v347_v33, 3  ;;  %v368_v42 = vrot.slane %v348_v34, 2 }
  0x31   : > { %v370_v43 = vrot.slane %v349_v35, 1  ;;  %v359_v44 = vsel %vm318_vm1, %v358_v37, %v342_v8  ;;  %v229_v45 = vsel %vm228_vm0, %v769_v0, 0.0  ;;  %v239_v46 = vrot.slane %v238_v20, 2 }
  0x32   : > { %v246_v47 = vrot.slane %v245_v21, 2  ;;  %v361_v48 = vsel %vm321_vm2, %v360_v38, %v359_v44  ;;  %v230_v49 = vrot.slane %v229_v45, 4  ;;  %v253_v50 = vrot.slane %v252_v24, 2 }
  0x33   : > { %v260_v51 = vrot.slane %v259_v25, 2  ;;  %v363_v52 = vsel %vm324_vm3, %v362_v39, %v361_v48  ;;  %v240_v53 = vadd.f32 %v239_v46, %v238_v20  ;;  %v267_v55 = vrot.slane %v266_v28, 2 }
  0x34   : > { %v247_v54 = vadd.f32 %v246_v47, %v245_v21  ;;  %v365_v56 = vsel %vm327_vm4, %v364_v40, %v363_v52  ;;  %v231_v57 = vadd.f32 %v230_v49, %v229_v45  ;;  %v254_v58 = vadd.f32 %v253_v50, %v252_v24 }
  0x35   : > { %v261_v59 = vadd.f32 %v260_v51, %v259_v25  ;;  %v367_v60 = vsel %vm330_vm5, %v366_v41, %v365_v56  ;;  %v241_v61 = vrot.slane %v240_v53, 1  ;;  %v268_v63 = vadd.f32 %v267_v55, %v266_v28 }
  0x36   : > { %v248_v62 = vrot.slane %v247_v54, 1  ;;  %v369_v6 = vsel %vm333_vm6, %v368_v42, %v367_v60  ;;  %v232_v7 = vrot.slane %v231_v57, 2  ;;  %v255_v8 = vrot.slane %v254_v58, 1 }
  0x37   : > { %v262_v9 = vrot.slane %v261_v59, 1  ;;  %v371_v12 = vsel %vm336_vm7, %v370_v43, %v369_v6  ;;  %v242_v13 = vadd.f32 %v241_v61, %v240_v53  ;;  %v269_v15 = vrot.slane %v268_v63, 1 }
  0x38   : > { %v249_v14 = vadd.f32 %v248_v62, %v247_v54  ;;  %v373_v16 = vsel %vm228_vm0, %v371_v12, 0.0  ;;  %v233_v17 = vadd.f32 %v232_v7, %v231_v57  ;;  %v256_v18 = vadd.f32 %v255_v8, %v254_v58 }
  0x39   : > { %v263_v19 = vadd.f32 %v262_v9, %v261_v59  ;;  %374 = vadd.xlane.f32.xlu0 %v373_v16  ;;  %v270_v20 = vadd.f32 %v269_v15, %v268_v63  ;;  %v274_v21 = vrot.slane %v273_v29, 2  ;;  %v281_v22 = vrot.slane %v280_v36, 2 }
  0x3a   : > { %v286_v23 = vsub.f32 %v242_v13, %v771_v1  ;;  %v234_v24 = vrot.slane %v233_v17, 1  ;;  %v287_v25 = vsub.f32 %v249_v14, %v773_v2  ;;  %v288_v26 = vsub.f32 %v256_v18, %v775_v3 }
  0x3b   : > { %v289_v27 = vsub.f32 %v263_v19, %v777_v4  ;;  %v275_v28 = vadd.f32 %v274_v21, %v273_v29  ;;  %v282_v30 = vadd.f32 %v281_v22, %v280_v36  ;;  %v290_v31 = vsub.f32 %v270_v20, %v779_v5 }
  0x3c   : > { %v294_v32 = vmul.f32 0.14285715, %v286_v23  ;;  %v235_v33 = vadd.f32 %v234_v24, %v233_v17  ;;  %v295_v34 = vmul.f32 0.14285715, %v287_v25  ;;  %v296_v35 = vmul.f32 0.14285715, %v288_v26 }
  0x3d   : > { %v297_v37 = vmul.f32 0.14285715, %v289_v27  ;;  %v276_v38 = vrot.slane %v275_v28, 1  ;;  %v283_v39 = vrot.slane %v282_v30, 1  ;;  %v298_v40 = vmul.f32 0.14285715, %v290_v31 }
  0x3e   : > { %v377_v41 = vmul.f32 %v294_v32, %v294_v32  ;;  %v285_v42 = vsub.f32 %v235_v33, %v769_v0  ;;  %v378_v43 = vmul.f32 %v295_v34, %v295_v34  ;;  %v379_v44 = vmul.f32 %v296_v35, %v296_v35 }
  0x3f   : > { %v380_v45 = vmul.f32 %v297_v37, %v297_v37  ;;  %v277_v46 = vadd.f32 %v276_v38, %v275_v28  ;;  %v284_v47 = vadd.f32 %v283_v39, %v282_v30  ;;  %v381_v29 = vmul.f32 %v298_v40, %v298_v40 }
  0x40   : > { %v392_v36 = vrot.slane %v377_v41, 7  ;;  %v293_v48 = vmul.f32 0.14285715, %v285_v42  ;;  %v394_v49 = vrot.slane %v378_v43, 6  ;;  %v396_v50 = vrot.slane %v379_v44, 5 }
  0x41   : > { %v398_v51 = vrot.slane %v380_v45, 4  ;;  %v291_v52 = vsub.f32 %v277_v46, %v789_v10  ;;  %v292_v53 = vsub.f32 %v284_v47, %v791_v11  ;;  %v400_v54 = vrot.slane %v381_v29, 3 }
  0x42   : > { %v302_v55 = vmul.f32 %v294_v32, %v771_v1  ;;  %v376_v56 = vmul.f32 %v293_v48, %v293_v48  ;;  %v301_v57 = vmul.f32 %v293_v48, %v769_v0  ;;  %v303_v58 = vmul.f32 %v295_v34, %v773_v2 }
  0x43   : > { %v304_v59 = vmul.f32 %v296_v35, %v775_v3  ;;  %v299_v60 = vmul.f32 0.14285715, %v291_v52  ;;  %v300_v61 = vmul.f32 0.14285715, %v292_v53  ;;  %v305_v62 = vmul.f32 %v297_v37, %v777_v4 }
  0x44   : > { %v306_v63 = vmul.f32 %v298_v40, %v779_v5  ;;  %v393_v6 = vsel %vm318_vm1, %v392_v36, %v376_v56  ;;  %v317_v7 = vrot.slane %v302_v55, 7  ;;  %v320_v8 = vrot.slane %v303_v58, 6 }
  0x45   : > { %v323_v9 = vrot.slane %v304_v59, 5  ;;  %v382_v12 = vmul.f32 %v299_v60, %v299_v60  ;;  %v383_v1 = vmul.f32 %v300_v61, %v300_v61  ;;  %v395_v13 = vsel %vm321_vm2, %v394_v49, %v393_v6  ;;  %v434_v49 = vld [vmem:[%s211_s28] sm:$0xff] }
  0x46   : > { %v307_v0 = vmul.f32 %v299_v60, %v789_v10  ;;  %v397_v2 = vsel %vm324_vm3, %v396_v50, %v395_v13  ;;  %v308_v3 = vmul.f32 %v300_v61, %v791_v11  ;;  %v319_v14 = vsel %vm318_vm1, %v317_v7, %v301_v57 }
  0x47   : > { %v326_v4 = vrot.slane %v305_v62, 4  ;;  %v399_v5 = vsel %vm327_vm4, %v398_v51, %v397_v2  ;;  %v402_v15 = vrot.slane %v382_v12, 2  ;;  %v404_v16 = vrot.slane %v383_v1, 1 }
  0x48   : > { %v322_v17 = vsel %vm321_vm2, %v320_v8, %v319_v14  ;;  %v401_v18 = vsel %vm330_vm5, %v400_v54, %v399_v5  ;;  %v329_v20 = vrot.slane %v306_v63, 3  ;;  %v332_v21 = vrot.slane %v307_v0, 2 }
  0x49   : > { %v325_v19 = vsel %vm324_vm3, %v323_v9, %v322_v17  ;;  %v403_v10 = vsel %vm333_vm6, %v402_v15, %v401_v18  ;;  %v335_v11 = vrot.slane %v308_v3, 1  ;;  %vm436_vm14 = vcmask 7168  }
  0x4a   : > { %v328_v22 = vsel %vm327_vm4, %v326_v4, %v325_v19  ;;  %v405_v23 = vsel %vm336_vm7, %v404_v16, %v403_v10 }
  0x4b   : > { %v331_v24 = vsel %vm330_vm5, %v329_v20, %v328_v22  ;;  %v407_v25 = vsel %vm228_vm0, %v405_v23, 0.0 }
  0x4c   : > { %v334_v26 = vsel %vm333_vm6, %v332_v21, %v331_v24  ;;  %408 = vadd.xlane.f32.xlu0 %v407_v25 }
  0x4d   : > { %v337_v27 = vsel %vm336_vm7, %v335_v11, %v334_v26 }
  0x4e   : > { %v339_v28 = vsel %vm228_vm0, %v337_v27, 0.0 }
  0x4f   : > { %340 = vadd.xlane.f32.xlu1 %v339_v28 }
  0xac   : > { %v375_v30 = vpop.xlane.xlu0 %374 }
  0xad   : > { %v410_v31 = vmax.f32 %v375_v30, 1e-16 }
  0xaf   : > { %603 = vrsqrt.f32 %v410_v31  ;;  %vm417_vm8 = vweird.f32 %v410_v31 }
  0xb5   : > { %v604_v32 = vpop.eup %603 }
  0xb6   : > { %v412_v33 = vmul.f32 %v604_v32, %v410_v31  ;;  %vm418_vm9 = vweird.f32 %v604_v32 }
  0xb7   : > { %vm419_vm12 = vmor %vm417_vm8, %vm418_vm9 }
  0xb8   : > { %v413_v37 = vmul.f32 %v604_v32, %v412_v33 }
  0xba   : > { %v414_v38 = vmul.f32 0.5, %v413_v37 }
  0xbc   : > { %v415_v41 = vsub.f32 1.5, %v414_v38 }
  0xbe   : > { %v416_v45 = vmul.f32 %v604_v32, %v415_v41 }
  0xbf   : > { %v409_v34 = vpop.xlane.xlu0 %408 }
  0xc0   : > { %v421_v35 = vmax.f32 %v409_v34, 1e-16  ;;  %v420_v47 = vsel %vm419_vm12, %v604_v32, %v416_v45 }
  0xc2   : > { %605 = vrsqrt.f32 %v421_v35  ;;  %vm428_vm11 = vweird.f32 %v421_v35  ;;  %v341_v36 = vpop.xlane.xlu1 %340 }
  0xc8   : > { %v606_v39 = vpop.eup %605 }
  0xc9   : > { %v423_v40 = vmul.f32 %v606_v39, %v421_v35  ;;  %vm429_vm10 = vweird.f32 %v606_v39 }
  0xca   : > { %vm430_vm13 = vmor %vm428_vm11, %vm429_vm10 }
  0xcb   : > { %v424_v42 = vmul.f32 %v606_v39, %v423_v40 }
  0xcd   : > { %v425_v43 = vmul.f32 0.5, %v424_v42 }
  0xcf   : > { %v426_v44 = vsub.f32 1.5, %v425_v43 }
  0xd1   : > { %v427_v46 = vmul.f32 %v606_v39, %v426_v44 }
  0xd3   : > { %v431_v29 = vsel %vm430_vm13, %v606_v39, %v427_v46 }
  0xd4   : > { %v432_v48 = vmul.f32 %v431_v29, %v420_v47 }
  0xd6   : > { %v433_v50 = vmul.f32 %v432_v48, %v341_v36 }
  0xd8   : > { %v435_v51 = vsub.f32 %v433_v50, %v434_v49  ;;  %437 = vst.msk [vmem:[%s215_s4] sm:$0xff] %vm436_vm14, %v433_v50 }
  0xda   : > { %v438_v52 = vmul.f32 %v435_v51, %v435_v51 }
  0xdc   : > { %439 = vst.msk [vmem:[%s219_s6] sm:$0xff] %vm436_vm14, %v438_v52 }
  0xdd PF: > { %p14_p7 = scmp.ge.s32.totalorder %s717_s17, 6   ;;  %s888_s12 = smov %s663_s13 }
  0xde   : > { %s889_s13 = smov %s667_s14  ;;  %s890_s14 = smov %s727_s20 }
  0xdf   : > { %s891_s15 = smov %s717_s17  ;;  %16 = sbr.rel (!%p14_p7) target bundleno = 3 (0x3), region = 83 }
  0xe4   :  { %473 = vsyncpa [#allocation3], 1 }
  0xe5   :  { %475 = vsyncpa [#allocation3 + $0x1], 1 }

</bundles_post_ra>
